<compile_context>
chip_gen: v7x
topology: tpu7x:2x2x1
jax: 0.10.0
libtpu: 0.0.40
codegen_flags: <defaults>
</compile_context>

<pallas_src>
import jax
import jax.numpy as jnp
from jax import lax
from jax.experimental import pallas as pl
from jax.experimental.pallas import tpu as pltpu

BN_EPS = 1e-5


def _stacked_ptblock2_kernel(x_hbm, w1_ref, w2_ref, w3_ref, bn_ref,
                             o_hbm, act_ref, copy_sem):
    """One grid step == one PointTransformerBlock2 layer (channels-first).

    x_hbm  : (P, N)  input point features in HBM (memory_space=pl.ANY, f32)
    w*_ref : (P, P)  this layer's nn.Linear weights, native (out, in)
    bn_ref : (P, 6)  this layer's BN affine, columns [g1 b1 g2 b2 g3 b3]
    o_hbm  : (P, N)  final output in HBM (memory_space=pl.ANY)
    act_ref: (P, N)  f32 VMEM scratch, activation carried across layers
    copy_sem: DMA semaphore for the one-shot in/out copies
    """
    layer = pl.program_id(0)

    # Bring x into VMEM exactly once; afterwards the activation lives in the
    # single lane-dense (P, N) scratch for the entire stack.
    @pl.when(layer == 0)
    def _():
        cp = pltpu.make_async_copy(x_hbm, act_ref, copy_sem)
        cp.start()
        cp.wait()

    act = act_ref[...]                       # (P, N) f32, this layer's input
    p_dim, n = act.shape
    inv_n = 1.0 / n

    bnp = bn_ref[...]                        # (P, 6)

    # Hoisted constants, shared by all three BNs of this layer.
    ones_row = jnp.ones((1, n), jnp.float32)                       # lane-dense
    rows = lax.broadcasted_iota(jnp.int32, (p_dim, p_dim), 0)
    cols = lax.broadcasted_iota(jnp.int32, (p_dim, p_dim), 1)
    eye_p = (rows == cols).astype(jnp.float32)                     # (P, P)

    contract_last = (((1,), (1,)), ((), ()))    # contract both dim-1 axes (N)

    def bn_fold(h, which, relu):
        # Folded training-mode BatchNorm1d (+ optional ReLU) on a (P, N) tile.
        # Statistics run on the MXU:
        #   sum_j h[i, j]    = h contracted with a ones row  -> (P, 1)
        #   sum_j h[i, j]^2  = diag(h @ h^T) from the Gram    -> (P, 1)
        # so the VALU only pays the scale/shift apply + ReLU per element.
        g = bnp[:, 2 * which:2 * which + 1]          # (P, 1)
        b = bnp[:, 2 * which + 1:2 * which + 2]      # (P, 1)
        mu = lax.dot_general(h, ones_row, contract_last,
                             preferred_element_type=jnp.float32) * inv_n
        gram = lax.dot_general(h, h, contract_last,
                               preferred_element_type=jnp.float32)   # (P, P)
        ms = jnp.sum(gram * eye_p, axis=1, keepdims=True) * inv_n    # (P, 1)
        var = jnp.maximum(ms - mu * mu, 0.0)
        s = g * lax.rsqrt(var + BN_EPS)              # rsqrt -> EUP slot
        out = h * s + (b - mu * s)                   # 1 mul + 1 add / element
        return jnp.maximum(out, 0.0) if relu else out

    # linear1 -> bn1 -> relu   (h = W1 @ act, native nn.Linear orientation)
    h = jnp.dot(w1_ref[...], act, preferred_element_type=jnp.float32)
    h = bn_fold(h, 0, relu=True)
    # linear2 -> bn2 -> relu
    h = jnp.dot(w2_ref[...], h, preferred_element_type=jnp.float32)
    h = bn_fold(h, 1, relu=True)
    # linear3 -> bn3
    h = jnp.dot(w3_ref[...], h, preferred_element_type=jnp.float32)
    h = bn_fold(h, 2, relu=False)

    # residual + relu, carried to the next layer (identity re-read from VMEM)
    act_ref[...] = jnp.maximum(h + act_ref[...], 0.0)

    # Write the final activation back to HBM exactly once (lane-dense copy).
    @pl.when(layer == pl.num_programs(0) - 1)
    def _():
        cp = pltpu.make_async_copy(act_ref, o_hbm, copy_sem)
        cp.start()
        cp.wait()


def point_transformer_blocks2(pxo, params_list):
    """Runs L stacked PointTransformerBlock2 layers in ONE pallas_call.

    params_list: sequence of per-layer dicts with keys
      w1, w2, w3            : (planes, planes) float32 (native nn.Linear layout)
      g1, b1, g2, b2, g3, b3: (planes,)        float32 (BatchNorm1d affine)
    """
    p, x, o = pxo
    n, c = x.shape
    num_layers = len(params_list)
    planes = params_list[0]["w1"].shape[0]
    # The residual (x += identity) requires in_planes == planes * expansion.
    assert c == planes, "PointTransformerBlock2 requires in_planes == planes"

    # Stack per-layer parameters along a leading layer axis; grid=(L,)
    # BlockSpecs index them per step.  No transposes on the hot path.
    w1s = jnp.stack([pp["w1"] for pp in params_list]).astype(jnp.float32)
    w2s = jnp.stack([pp["w2"] for pp in params_list]).astype(jnp.float32)
    w3s = jnp.stack([pp["w3"] for pp in params_list]).astype(jnp.float32)
    bns = jnp.stack([
        jnp.stack([pp["g1"], pp["b1"], pp["g2"], pp["b2"], pp["g3"], pp["b3"]],
                  axis=1)
        for pp in params_list]).astype(jnp.float32)                # (L, P, 6)

    # Channels-first, lane-dense layout for the kernel (N on the lane axis).
    x_t = jnp.asarray(x, jnp.float32).T                            # (P, N)

    def layer_spec(shape):
        nd = len(shape)
        return pl.BlockSpec((None,) + shape, lambda l, _nd=nd: (l,) + (0,) * _nd)

    # Scoped-VMEM budget: one resident (P, N) f32 activation buffer plus
    # headroom for Mosaic's transient (P, N) intermediates and weight buffers.
    act_bytes = planes * n * 4
    try:
        phys_vmem = int(pltpu.get_tpu_info().vmem_capacity_bytes)
    except Exception:
        phys_vmem = 64 * 1024 * 1024            # v7x physical — safe everywhere
    vmem_limit = int(min(phys_vmem, 8 * 1024 * 1024 + 6 * act_bytes))

    # 3 linears + 3 Gram-stat matmuls (each 2*P*P*N) + 3 ones-row matmuls.
    flops = num_layers * (12 * n * planes * planes + 6 * n * planes)
    transcendentals = num_layers * 3 * planes                      # rsqrt per BN
    bytes_accessed = (2 * n * planes * 4
                      + num_layers * (3 * planes * planes + planes * 6) * 4)

    out_t = pl.pallas_call(
        _stacked_ptblock2_kernel,
        out_shape=jax.ShapeDtypeStruct((planes, n), jnp.float32),
        grid=(num_layers,),
        in_specs=[
            pl.BlockSpec(memory_space=pl.ANY),    # x (P, N): HBM, manual DMA
            layer_spec((planes, planes)),         # w1[l]
            layer_spec((planes, planes)),         # w2[l]
            layer_spec((planes, planes)),         # w3[l]
            layer_spec((planes, 6)),              # packed BN affine[l]
        ],
        out_specs=pl.BlockSpec(memory_space=pl.ANY),   # out (P, N): HBM
        scratch_shapes=[
            pltpu.VMEM((planes, n), jnp.float32),      # only n-sized VMEM buf
            pltpu.SemaphoreType.DMA,                   # in/out copy semaphore
        ],
        compiler_params=pltpu.CompilerParams(
            dimension_semantics=("arbitrary",),        # layers are sequential
            vmem_limit_bytes=vmem_limit),
        cost_estimate=pl.CostEstimate(
            flops=flops,
            transcendentals=transcendentals,
            bytes_accessed=bytes_accessed),
    )(x_t, w1s, w2s, w3s, bns)

    return [p, out_t.T.astype(x.dtype), o]


def point_transformer_block2(pxo, params):
    """Single-block API matching the PyTorch module's forward."""
    return point_transformer_blocks2(pxo, [params])


def init_params(key, in_planes, planes):
    ks = jax.random.split(key, 9)

    def lin(k, fan_out, fan_in):
        bound = 1.0 / jnp.sqrt(fan_in)
        return jax.random.uniform(k, (fan_out, fan_in), jnp.float32, -bound, bound)

    return {
        "w1": lin(ks[0], planes, in_planes),
        "w2": lin(ks[1], planes, planes),
        "w3": lin(ks[2], planes, planes),
        "g1": 1.0 + 0.1 * jax.random.normal(ks[3], (planes,), jnp.float32),
        "b1": 0.1 * jax.random.normal(ks[4], (planes,), jnp.float32),
        "g2": 1.0 + 0.1 * jax.random.normal(ks[5], (planes,), jnp.float32),
        "b2": 0.1 * jax.random.normal(ks[6], (planes,), jnp.float32),
        "g3": 1.0 + 0.1 * jax.random.normal(ks[7], (planes,), jnp.float32),
        "b3": 0.1 * jax.random.normal(ks[8], (planes,), jnp.float32),
    }


def _reference_block(x, pp):
    # Pure-JAX reference of the PyTorch forward (training-mode BatchNorm1d).
    def bn(h, g, b):
        mu = h.mean(0, keepdims=True)
        var = ((h - mu) ** 2).mean(0, keepdims=True)
        return (h - mu) / jnp.sqrt(var + BN_EPS) * g + b

    h = jnp.maximum(bn(x @ pp["w1"].T, pp["g1"], pp["b1"]), 0.0)
    h = jnp.maximum(bn(h @ pp["w2"].T, pp["g2"], pp["b2"]), 0.0)
    h = bn(h @ pp["w3"].T, pp["g3"], pp["b3"])
    return jnp.maximum(h + x, 0.0)


if __name__ == "__main__":
    key = jax.random.PRNGKey(0)
    k_p, k_x, k_w = jax.random.split(key, 3)

    n_points = 256          # total points across batch (BatchNorm1d batch dim)
    planes = 32             # residual requires in_planes == planes * expansion
    num_layers = 4          # stacked blocks fused into one pallas_call

    p = jax.random.normal(k_p, (n_points, 3), jnp.float32)        # xyz coords
    x = jax.random.normal(k_x, (n_points, planes), jnp.float32)
    o = jnp.array([128, 256], jnp.int32)                          # batch offsets

    layer_keys = jax.random.split(k_w, num_layers)
    params_list = [init_params(k, planes, planes) for k in layer_keys]

    # ---- fused L-layer stack (the launch-overhead-amortized path) ----
    p_out, x_out, o_out = point_transformer_blocks2((p, x, o), params_list)
    x_out = jax.block_until_ready(x_out)

    ref = x
    for pp in params_list:
        ref = _reference_block(ref, pp)

    assert x_out.shape == (n_points, planes)
    assert jnp.allclose(x_out, ref, atol=2e-3, rtol=2e-3), \
        "stacked kernel mismatch vs reference"

    # ---- single-block path (original module semantics) ----
    _, x1, _ = point_transformer_block2((p, x, o), params_list[0])
    x1 = jax.block_until_ready(x1)
    ref1 = _reference_block(x, params_list[0])
    assert jnp.allclose(x1, ref1, atol=1e-3, rtol=1e-3), \
        "single-block kernel mismatch vs reference"

    print("KERNEL_OK")
</pallas_src>

<mosaic_0001>
module attributes {stable_mosaic.version = 11 : i64} {
  func.func @_stacked_ptblock2_kernel(%arg0: i32, %arg1: memref<32x256xf32, #tpu.memory_space<any>>, %arg2: memref<1x32x32xf32, #tpu.memory_space<vmem>>, %arg3: memref<1x32x32xf32, #tpu.memory_space<vmem>>, %arg4: memref<1x32x32xf32, #tpu.memory_space<vmem>>, %arg5: memref<1x32x6xf32, #tpu.memory_space<vmem>>, %arg6: memref<32x256xf32, #tpu.memory_space<any>>, %arg7: memref<32x256xf32, #tpu.memory_space<vmem>>, %arg8: memref<!tpu.dma_semaphore, #tpu.memory_space<semaphore_mem>>) attributes {dimension_semantics = [#tpu.dimension_semantics<arbitrary>], iteration_bounds = array<i64: 4>, scalar_prefetch = 0 : i64, scratch_operands = 2 : i64, tpu.core_type = #tpu.core_type<tc>, window_params = [{}, {transform_indices = @transform_1, window_bounds = array<i64: 1, 32, 32>}, {transform_indices = @transform_2, window_bounds = array<i64: 1, 32, 32>}, {transform_indices = @transform_3, window_bounds = array<i64: 1, 32, 32>}, {transform_indices = @transform_4, window_bounds = array<i64: 1, 32, 6>}, {}]} {
    %c0_i32 = arith.constant 0 : i32
    %0 = arith.cmpi eq, %arg0, %c0_i32 : i32
    %1 = arith.extui %0 : i1 to i32
    %c0_i32_0 = arith.constant 0 : i32
    %2 = arith.cmpi ne, %1, %c0_i32_0 : i32
    scf.if %2 {
      tpu.enqueue_dma source(%arg1 : memref<32x256xf32, #tpu.memory_space<any>>) target(%arg7 : memref<32x256xf32, #tpu.memory_space<vmem>>) target_semaphore(%arg8 : memref<!tpu.dma_semaphore, #tpu.memory_space<semaphore_mem>>)
      tpu.wait_dma2 semaphore(%arg8 : memref<!tpu.dma_semaphore, #tpu.memory_space<semaphore_mem>>) src(%arg1 : memref<32x256xf32, #tpu.memory_space<any>>) dst(%arg7 : memref<32x256xf32, #tpu.memory_space<vmem>>)
    } else {
    }
    %c0 = arith.constant 0 : index
    %c0_1 = arith.constant 0 : index
    %3 = vector.load %arg7[%c0, %c0_1] : memref<32x256xf32, #tpu.memory_space<vmem>>, vector<32x256xf32>
    %c0_2 = arith.constant 0 : index
    %c0_3 = arith.constant 0 : index
    %c0_4 = arith.constant 0 : index
    %4 = vector.load %arg5[%c0_2, %c0_3, %c0_4] : memref<1x32x6xf32, #tpu.memory_space<vmem>>, vector<1x32x6xf32>
    %5 = vector.shape_cast %4 : vector<1x32x6xf32> to vector<32x6xf32>
    %cst = arith.constant 1.000000e+00 : f32
    %6 = vector.broadcast %cst : f32 to vector<1x256xf32>
    %7 = tpu.iota {dimensions = array<i32: 0>} : vector<32x32xi32>
    %8 = tpu.iota {dimensions = array<i32: 1>} : vector<32x32xi32>
    %9 = arith.cmpi eq, %7, %8 : vector<32x32xi32>
    %10 = arith.extui %9 : vector<32x32xi1> to vector<32x32xi32>
    %11 = arith.sitofp %10 : vector<32x32xi32> to vector<32x32xf32>
    %c0_5 = arith.constant 0 : index
    %c0_6 = arith.constant 0 : index
    %c0_7 = arith.constant 0 : index
    %12 = vector.load %arg2[%c0_5, %c0_6, %c0_7] : memref<1x32x32xf32, #tpu.memory_space<vmem>>, vector<1x32x32xf32>
    %13 = vector.shape_cast %12 : vector<1x32x32xf32> to vector<32x32xf32>
    %cst_8 = arith.constant dense<0.000000e+00> : vector<32x256xf32>
    %14 = tpu.matmul %13, %3, %cst_8 {dimension_numbers = #tpu.dot_dimension_numbers<[1], [0], [0], [1], [0, 0, 1, 1], [], []>} : vector<32x32xf32>, vector<32x256xf32>, vector<32x256xf32> -> vector<32x256xf32>
    %15 = vector.extract_strided_slice %5 {offsets = [0, 0], sizes = [32, 1], strides = [1, 1]} : vector<32x6xf32> to vector<32x1xf32>
    %16 = vector.extract_strided_slice %5 {offsets = [0, 1], sizes = [32, 1], strides = [1, 1]} : vector<32x6xf32> to vector<32x1xf32>
    %cst_9 = arith.constant dense<0.000000e+00> : vector<32x1xf32>
    %17 = tpu.matmul %14, %6, %cst_9 {dimension_numbers = #tpu.dot_dimension_numbers<[1], [1], [0], [0], [0, 0, 1, 0], [], []>} : vector<32x256xf32>, vector<1x256xf32>, vector<32x1xf32> -> vector<32x1xf32>
    %cst_10 = arith.constant 3.906250e-03 : f32
    %18 = vector.broadcast %cst_10 : f32 to vector<32x1xf32>
    %19 = arith.mulf %17, %18 : vector<32x1xf32>
    %cst_11 = arith.constant dense<0.000000e+00> : vector<32x32xf32>
    %20 = tpu.matmul %14, %14, %cst_11 {dimension_numbers = #tpu.dot_dimension_numbers<[1], [1], [0], [0], [0, 0, 1, 0], [], []>} : vector<32x256xf32>, vector<32x256xf32>, vector<32x32xf32> -> vector<32x32xf32>
    %21 = arith.mulf %20, %11 : vector<32x32xf32>
    %cst_12 = arith.constant dense<0.000000e+00> : vector<32xf32>
    %22 = vector.multi_reduction <add>, %21, %cst_12 [1] : vector<32x32xf32> to vector<32xf32>
    %23 = vector.shape_cast %22 : vector<32xf32> to vector<32x1xf32>
    %cst_13 = arith.constant 3.906250e-03 : f32
    %24 = vector.broadcast %cst_13 : f32 to vector<32x1xf32>
    %25 = arith.mulf %23, %24 : vector<32x1xf32>
    %26 = arith.mulf %19, %19 : vector<32x1xf32>
    %27 = arith.subf %25, %26 : vector<32x1xf32>
    %cst_14 = arith.constant 0.000000e+00 : f32
    %28 = vector.broadcast %cst_14 : f32 to vector<32x1xf32>
    %29 = arith.maximumf %27, %28 : vector<32x1xf32>
    %cst_15 = arith.constant 9.99999974E-6 : f32
    %30 = vector.broadcast %cst_15 : f32 to vector<32x1xf32>
    %31 = arith.addf %29, %30 : vector<32x1xf32>
    %32 = math.rsqrt %31 : vector<32x1xf32>
    %33 = arith.mulf %15, %32 : vector<32x1xf32>
    %34 = vector.broadcast %33 : vector<32x1xf32> to vector<32x256xf32>
    %35 = arith.mulf %14, %34 : vector<32x256xf32>
    %36 = arith.mulf %19, %33 : vector<32x1xf32>
    %37 = arith.subf %16, %36 : vector<32x1xf32>
    %38 = vector.broadcast %37 : vector<32x1xf32> to vector<32x256xf32>
    %39 = arith.addf %35, %38 : vector<32x256xf32>
    %cst_16 = arith.constant 0.000000e+00 : f32
    %40 = vector.broadcast %cst_16 : f32 to vector<32x256xf32>
    %41 = arith.maximumf %39, %40 : vector<32x256xf32>
    %c0_17 = arith.constant 0 : index
    %c0_18 = arith.constant 0 : index
    %c0_19 = arith.constant 0 : index
    %42 = vector.load %arg3[%c0_17, %c0_18, %c0_19] : memref<1x32x32xf32, #tpu.memory_space<vmem>>, vector<1x32x32xf32>
    %43 = vector.shape_cast %42 : vector<1x32x32xf32> to vector<32x32xf32>
    %cst_20 = arith.constant dense<0.000000e+00> : vector<32x256xf32>
    %44 = tpu.matmul %43, %41, %cst_20 {dimension_numbers = #tpu.dot_dimension_numbers<[1], [0], [0], [1], [0, 0, 1, 1], [], []>} : vector<32x32xf32>, vector<32x256xf32>, vector<32x256xf32> -> vector<32x256xf32>
    %45 = vector.extract_strided_slice %5 {offsets = [0, 2], sizes = [32, 1], strides = [1, 1]} : vector<32x6xf32> to vector<32x1xf32>
    %46 = vector.extract_strided_slice %5 {offsets = [0, 3], sizes = [32, 1], strides = [1, 1]} : vector<32x6xf32> to vector<32x1xf32>
    %cst_21 = arith.constant dense<0.000000e+00> : vector<32x1xf32>
    %47 = tpu.matmul %44, %6, %cst_21 {dimension_numbers = #tpu.dot_dimension_numbers<[1], [1], [0], [0], [0, 0, 1, 0], [], []>} : vector<32x256xf32>, vector<1x256xf32>, vector<32x1xf32> -> vector<32x1xf32>
    %cst_22 = arith.constant 3.906250e-03 : f32
    %48 = vector.broadcast %cst_22 : f32 to vector<32x1xf32>
    %49 = arith.mulf %47, %48 : vector<32x1xf32>
    %cst_23 = arith.constant dense<0.000000e+00> : vector<32x32xf32>
    %50 = tpu.matmul %44, %44, %cst_23 {dimension_numbers = #tpu.dot_dimension_numbers<[1], [1], [0], [0], [0, 0, 1, 0], [], []>} : vector<32x256xf32>, vector<32x256xf32>, vector<32x32xf32> -> vector<32x32xf32>
    %51 = arith.mulf %50, %11 : vector<32x32xf32>
    %cst_24 = arith.constant dense<0.000000e+00> : vector<32xf32>
    %52 = vector.multi_reduction <add>, %51, %cst_24 [1] : vector<32x32xf32> to vector<32xf32>
    %53 = vector.shape_cast %52 : vector<32xf32> to vector<32x1xf32>
    %cst_25 = arith.constant 3.906250e-03 : f32
    %54 = vector.broadcast %cst_25 : f32 to vector<32x1xf32>
    %55 = arith.mulf %53, %54 : vector<32x1xf32>
    %56 = arith.mulf %49, %49 : vector<32x1xf32>
    %57 = arith.subf %55, %56 : vector<32x1xf32>
    %cst_26 = arith.constant 0.000000e+00 : f32
    %58 = vector.broadcast %cst_26 : f32 to vector<32x1xf32>
    %59 = arith.maximumf %57, %58 : vector<32x1xf32>
    %cst_27 = arith.constant 9.99999974E-6 : f32
    %60 = vector.broadcast %cst_27 : f32 to vector<32x1xf32>
    %61 = arith.addf %59, %60 : vector<32x1xf32>
    %62 = math.rsqrt %61 : vector<32x1xf32>
    %63 = arith.mulf %45, %62 : vector<32x1xf32>
    %64 = vector.broadcast %63 : vector<32x1xf32> to vector<32x256xf32>
    %65 = arith.mulf %44, %64 : vector<32x256xf32>
    %66 = arith.mulf %49, %63 : vector<32x1xf32>
    %67 = arith.subf %46, %66 : vector<32x1xf32>
    %68 = vector.broadcast %67 : vector<32x1xf32> to vector<32x256xf32>
    %69 = arith.addf %65, %68 : vector<32x256xf32>
    %cst_28 = arith.constant 0.000000e+00 : f32
    %70 = vector.broadcast %cst_28 : f32 to vector<32x256xf32>
    %71 = arith.maximumf %69, %70 : vector<32x256xf32>
    %c0_29 = arith.constant 0 : index
    %c0_30 = arith.constant 0 : index
    %c0_31 = arith.constant 0 : index
    %72 = vector.load %arg4[%c0_29, %c0_30, %c0_31] : memref<1x32x32xf32, #tpu.memory_space<vmem>>, vector<1x32x32xf32>
    %73 = vector.shape_cast %72 : vector<1x32x32xf32> to vector<32x32xf32>
    %cst_32 = arith.constant dense<0.000000e+00> : vector<32x256xf32>
    %74 = tpu.matmul %73, %71, %cst_32 {dimension_numbers = #tpu.dot_dimension_numbers<[1], [0], [0], [1], [0, 0, 1, 1], [], []>} : vector<32x32xf32>, vector<32x256xf32>, vector<32x256xf32> -> vector<32x256xf32>
    %75 = vector.extract_strided_slice %5 {offsets = [0, 4], sizes = [32, 1], strides = [1, 1]} : vector<32x6xf32> to vector<32x1xf32>
    %76 = vector.extract_strided_slice %5 {offsets = [0, 5], sizes = [32, 1], strides = [1, 1]} : vector<32x6xf32> to vector<32x1xf32>
    %cst_33 = arith.constant dense<0.000000e+00> : vector<32x1xf32>
    %77 = tpu.matmul %74, %6, %cst_33 {dimension_numbers = #tpu.dot_dimension_numbers<[1], [1], [0], [0], [0, 0, 1, 0], [], []>} : vector<32x256xf32>, vector<1x256xf32>, vector<32x1xf32> -> vector<32x1xf32>
    %cst_34 = arith.constant 3.906250e-03 : f32
    %78 = vector.broadcast %cst_34 : f32 to vector<32x1xf32>
    %79 = arith.mulf %77, %78 : vector<32x1xf32>
    %cst_35 = arith.constant dense<0.000000e+00> : vector<32x32xf32>
    %80 = tpu.matmul %74, %74, %cst_35 {dimension_numbers = #tpu.dot_dimension_numbers<[1], [1], [0], [0], [0, 0, 1, 0], [], []>} : vector<32x256xf32>, vector<32x256xf32>, vector<32x32xf32> -> vector<32x32xf32>
    %81 = arith.mulf %80, %11 : vector<32x32xf32>
    %cst_36 = arith.constant dense<0.000000e+00> : vector<32xf32>
    %82 = vector.multi_reduction <add>, %81, %cst_36 [1] : vector<32x32xf32> to vector<32xf32>
    %83 = vector.shape_cast %82 : vector<32xf32> to vector<32x1xf32>
    %cst_37 = arith.constant 3.906250e-03 : f32
    %84 = vector.broadcast %cst_37 : f32 to vector<32x1xf32>
    %85 = arith.mulf %83, %84 : vector<32x1xf32>
    %86 = arith.mulf %79, %79 : vector<32x1xf32>
    %87 = arith.subf %85, %86 : vector<32x1xf32>
    %cst_38 = arith.constant 0.000000e+00 : f32
    %88 = vector.broadcast %cst_38 : f32 to vector<32x1xf32>
    %89 = arith.maximumf %87, %88 : vector<32x1xf32>
    %cst_39 = arith.constant 9.99999974E-6 : f32
    %90 = vector.broadcast %cst_39 : f32 to vector<32x1xf32>
    %91 = arith.addf %89, %90 : vector<32x1xf32>
    %92 = math.rsqrt %91 : vector<32x1xf32>
    %93 = arith.mulf %75, %92 : vector<32x1xf32>
    %94 = vector.broadcast %93 : vector<32x1xf32> to vector<32x256xf32>
    %95 = arith.mulf %74, %94 : vector<32x256xf32>
    %96 = arith.mulf %79, %93 : vector<32x1xf32>
    %97 = arith.subf %76, %96 : vector<32x1xf32>
    %98 = vector.broadcast %97 : vector<32x1xf32> to vector<32x256xf32>
    %99 = arith.addf %95, %98 : vector<32x256xf32>
    %c0_40 = arith.constant 0 : index
    %c0_41 = arith.constant 0 : index
    %100 = vector.load %arg7[%c0_40, %c0_41] : memref<32x256xf32, #tpu.memory_space<vmem>>, vector<32x256xf32>
    %101 = arith.addf %99, %100 : vector<32x256xf32>
    %cst_42 = arith.constant 0.000000e+00 : f32
    %102 = vector.broadcast %cst_42 : f32 to vector<32x256xf32>
    %103 = arith.maximumf %101, %102 : vector<32x256xf32>
    %c0_43 = arith.constant 0 : index
    %c0_44 = arith.constant 0 : index
    %104 = vector.load %arg7[%c0_43, %c0_44] : memref<32x256xf32, #tpu.memory_space<vmem>>, vector<32x256xf32>
    tpu.vector_store %arg7[%c0_43, %c0_44], %103 {strides = array<i32>} : memref<32x256xf32, #tpu.memory_space<vmem>>, vector<32x256xf32>,
    %c3_i32 = arith.constant 3 : i32
    %105 = arith.cmpi eq, %arg0, %c3_i32 : i32
    %106 = arith.extui %105 : i1 to i32
    %c0_i32_45 = arith.constant 0 : i32
    %107 = arith.cmpi ne, %106, %c0_i32_45 : i32
    scf.if %107 {
      tpu.enqueue_dma source(%arg7 : memref<32x256xf32, #tpu.memory_space<vmem>>) target(%arg6 : memref<32x256xf32, #tpu.memory_space<any>>) target_semaphore(%arg8 : memref<!tpu.dma_semaphore, #tpu.memory_space<semaphore_mem>>)
      tpu.wait_dma2 semaphore(%arg8 : memref<!tpu.dma_semaphore, #tpu.memory_space<semaphore_mem>>) src(%arg7 : memref<32x256xf32, #tpu.memory_space<vmem>>) dst(%arg6 : memref<32x256xf32, #tpu.memory_space<any>>)
    } else {
    }
    return
  }
  func.func @transform_1(%arg0: i32) -> (i32, i32, i32) {
    %c0_i32 = arith.constant 0 : i32
    %c0_i32_0 = arith.constant 0 : i32
    %c0_i32_1 = arith.constant 0 : i32
    return %arg0, %c0_i32, %c0_i32_0 : i32, i32, i32
  }
  func.func @transform_2(%arg0: i32) -> (i32, i32, i32) {
    %c0_i32 = arith.constant 0 : i32
    %c0_i32_0 = arith.constant 0 : i32
    %c0_i32_1 = arith.constant 0 : i32
    return %arg0, %c0_i32, %c0_i32_0 : i32, i32, i32
  }
  func.func @transform_3(%arg0: i32) -> (i32, i32, i32) {
    %c0_i32 = arith.constant 0 : i32
    %c0_i32_0 = arith.constant 0 : i32
    %c0_i32_1 = arith.constant 0 : i32
    return %arg0, %c0_i32, %c0_i32_0 : i32, i32, i32
  }
  func.func @transform_4(%arg0: i32) -> (i32, i32, i32) {
    %c0_i32 = arith.constant 0 : i32
    %c0_i32_0 = arith.constant 0 : i32
    %c0_i32_1 = arith.constant 0 : i32
    return %arg0, %c0_i32, %c0_i32_0 : i32, i32, i32
  }
}

</mosaic_0001>

<bundles_post_ra>
// kernel: tpu_custom_call.1
= control target key start
LH: loop header
LB: loop body
LE: loop exit
PB: predicated region body
PF: predicated region fallthrough
CT: control target
= control target key end

     0   :  { %10 = vsyncpa [#allocation5], 0  ;;  %s2320_s0 = inlined_call_operand.hbm [shape: f32[32,256], index: 0, kind: input, shape index: {}]   ;;  %s2321_s1 = inlined_call_operand.vmem [shape: f32[4,32,32], index: 1, kind: input, shape index: {}]   ;;  %s2322_s2 = inlined_call_operand.hbm [shape: f32[4,32,32], index: 2, kind: input, shape index: {}]   ;;  %s2323_s3 = inlined_call_operand.hbm [shape: f32[4,32,32], index: 3, kind: input, shape index: {}]   ;;  %s2324_s4 = inlined_call_operand.vmem [shape: f32[4,32,6], index: 4, kind: input, shape index: {}]   ;;  %s2325_s5 = inlined_call_operand.hbm [shape: f32[32,256], index: 5, kind: output, shape index: {}]  }
   0x1   :  { %12 = vsyncpa [#allocation5 + $0x1], 0 }
   0x2   :  { %13 = vsyncpa [#allocation7], 0 }
   0x3   :  { %15 = vsyncpa [#allocation7 + $0x1], 0  ;;  %s1812_s18 = smov 0   ;;  %s1814_s19 = smov 0  }
   0x4   :  { %s1816_s20 = smov 0   ;;  %s1818_s21 = smov 0  }
   0x5 LB: > { %s1831_s22 = sadd.s32 4294967295, %s1767_s21   ;;  %s1834_s23 = sadd.s32 1, %s1767_s21   ;;  %s1767_s21 = sphi %s1818_s21, %s2337_s21   ;;  %s1763_s20 = sphi %s1816_s20, %s2336_s20   ;;  %s1759_s19 = sphi %s1814_s19, %s2335_s19   ;;  %s1755_s18 = sphi %s1812_s18, %s2334_s18  }
   0x6   : > { %s43_s24 = ssub.s32 %s1767_s21, %s1834_s23  ;;  %s46_s25 = sadd.s32 1, %s1763_s20 }
   0x7   : > { %p44_p0 = scmp.eq.s32.totalorder %s43_s24, 0  ;;  %p52_p1 = scmp.ne.s32.totalorder %s1763_s20, %s1759_s19 }
   0x8   : > { %p53_p2 = scmp.eq.s32.totalorder %s1767_s21, 0  ;;  %p59_p3 = scmp.ne.s32.totalorder %s1759_s19, %s1755_s18 }
   0x9   : > { %s1844_s26 = scalar_select %p44_p0, %s1763_s20, %s46_s25  }
   0xa   : > { %p54_p4 = por %p53_p2, %p52_p1  ;;  %p2326_p5 = scmp.eq.s32.totalorder %s1831_s22, 0 }
   0xb   : > { %p1519_p6 = scmp.lt.s32.totalorder %s1767_s21, 4  ;;  %s1855_s28 = sand.u32 1, %s1763_s20  }
   0xc   : > { %p1850_p7 = por %p2326_p5, %p59_p3  ;;  %s1413_s29 = sshll.u32 %s1855_s28, 5 }
   0xd   : > { %s1446_s30 = sshll.u32 %s1767_s21, 9  ;;  %s124_s9 = scalar_lea.vmem [#allocation4], %s1413_s29 }
   0xe   : > { %s1864_s8 = scalar_lea.hbm %s2322_s2, %s1446_s30  ;;  %s131_s10 = sshll.u32 %s124_s9, 4  ;;  %s1868_s10 = int_to_ptr.vmem [resolvable:$true] %s131_s10 }
   0xf   : > { %p1870_p8 = pnand %p1519_p6, %p54_p4  ;;  %s121_s12 = scalar_lea.sflag [#allocation5], %s1855_s28 }
  0x10   : > { %s1609_s13 = scalar_lea.hbm %s1864_s8, 512  ;;  %s1614_s16 = scalar_lea.hbm %s2322_s2, 2048 }
  0x11   : > { %p1610_p9 = scmp.ne.s32.totalorder %s1864_s8, %s1609_s13  ;;  %p1611_p10 = pneg %p1870_p8 }
  0x12   : > { %p1615_p13 = scmp.lt.u32.totalorder %s1864_s8, %s2322_s2  ;;  %p1616_p0 = scmp.lt.u32.totalorder %s1614_s16, %s1609_s13 }
  0x13   : > { %p1612_p11 = pnand %p1611_p10, %p1610_p9  ;;  %p1618_p2 = scmp.lt.u32.totalorder %s1609_s13, %s1864_s8 }
  0x14   : > { %p1617_p1 = por %p1616_p0, %p1615_p13 }
  0x15   : > { %p1613_p12 = pneg %p1612_p11 }
  0x16   : > { %p1619_p3 = por %p1618_p2, %p1617_p1 }
  0x18   : > { %p1620_p4 = pnand %p1619_p3, %p1613_p12 }
  0x1a   : > { %1623 = shalt.err (!%p1620_p4)
}
  0x1b   : > { %s1624_s24 = scalar_lea.vmem %s1868_s10, 512  ;;  %s1769_s25 = smov [#allocation4]  }
  0x1c   : > { %p1625_p6 = scmp.ne.s32.totalorder %s1868_s10, %s1624_s24  ;;  %s1629_s6 = sshll.u32 %s1769_s25, 4  ;;  %s1630_s6 = int_to_ptr.vmem [resolvable:$false] %s1629_s6 }
  0x1d   : > { %s1631_s7 = scalar_lea.vmem %s1630_s6, 1024  ;;  %p1632_p5 = scmp.lt.s32.totalorder %s1868_s10, %s1630_s6 }
  0x1e   : > { %p1627_p9 = pnand %p1625_p6, %p1611_p10  ;;  %p1633_p13 = scmp.lt.s32.totalorder %s1631_s7, %s1624_s24 }
  0x20   : > { %p1628_p11 = pneg %p1627_p9  ;;  %p1634_p0 = por %p1633_p13, %p1632_p5 }
  0x22   : > { %p1635_p1 = pnand %p1634_p0, %p1628_p11 }
  0x24   : > { %1638 = shalt.err (!%p1635_p1)
}
  0x25   : > { %s1770_s9 = smov 128   ;;  %s1771_s13 = smov 8  }
  0x26   : > { %1515 = dma.hbm_to_vmem [thread:$0]  (!%p1870_p8), %s1864_s8, 512, %s1868_s10, %s121_s12, %s1770_s9, %s1770_s9, %s1771_s13  }
  0x27   : > { %s1910_s16 = scalar_lea.hbm %s2323_s3, %s1446_s30  ;;  %s145_s17 = scalar_lea.vmem [#allocation6], %s1413_s29 }
  0x28   : > { %s152_s18 = sshll.u32 %s145_s17, 4  ;;  %s142_s24 = scalar_lea.sflag [#allocation7], %s1855_s28  ;;  %s1914_s18 = int_to_ptr.vmem [resolvable:$true] %s152_s18 }
  0x29   : > { %s1639_s25 = scalar_lea.hbm %s1910_s16, 512  ;;  %s1644_s30 = scalar_lea.hbm %s2323_s3, 2048 }
  0x2a   : > { %p1640_p5 = scmp.ne.s32.totalorder %s1910_s16, %s1639_s25  ;;  %p1645_p3 = scmp.lt.u32.totalorder %s1910_s16, %s2323_s3 }
  0x2b   : > { %p1646_p4 = scmp.lt.u32.totalorder %s1644_s30, %s1639_s25  ;;  %p1648_p9 = scmp.lt.u32.totalorder %s1639_s25, %s1910_s16 }
  0x2c   : > { %p1642_p12 = pnand %p1640_p5, %p1611_p10 }
  0x2d   : > { %p1647_p6 = por %p1646_p4, %p1645_p3 }
  0x2e   : > { %p1643_p2 = pneg %p1642_p12 }
  0x2f   : > { %p1649_p11 = por %p1648_p9, %p1647_p6 }
  0x31   : > { %p1650_p13 = pnand %p1649_p11, %p1643_p2 }
  0x33   : > { %1653 = shalt.err (!%p1650_p13)
}
  0x34   : > { %s1654_s29 = scalar_lea.vmem %s1914_s18, 512  ;;  %s1772_s7 = smov [#allocation6]  }
  0x35   : > { %p1655_p0 = scmp.ne.s32.totalorder %s1914_s18, %s1654_s29  ;;  %s1659_s14 = sshll.u32 %s1772_s7, 4  ;;  %s1660_s14 = int_to_ptr.vmem [resolvable:$false] %s1659_s14 }
  0x36   : > { %s1661_s15 = scalar_lea.vmem %s1660_s14, 1024  ;;  %p1662_p12 = scmp.lt.s32.totalorder %s1914_s18, %s1660_s14 }
  0x37   : > { %p1657_p1 = pnand %p1655_p0, %p1611_p10  ;;  %p1663_p3 = scmp.lt.s32.totalorder %s1661_s15, %s1654_s29 }
  0x39   : > { %p1658_p5 = pneg %p1657_p1  ;;  %p1664_p4 = por %p1663_p3, %p1662_p12 }
  0x3b   : > { %p1665_p6 = pnand %p1664_p4, %p1658_p5 }
  0x3d   : > { %1668 = shalt.err (!%p1665_p6)
}
  0x3e   : > { %1518 = dma.hbm_to_vmem [thread:$0]  (!%p1870_p8), %s1910_s16, 512, %s1914_s18, %s142_s24, %s1770_s9, %s1770_s9, %s1771_s13  }
  0x3f   : > { %p1420_p10 = scmp.lt.s32.totalorder %s1767_s21, 1 }
  0x40   : > { %s172_s17 = sand.u32 (!%p1420_p10), 1, %s1759_s19  }
  0x41   : > { %170 = sbr.rel (%p1420_p10) target bundleno = 2767 (0xacf), region = 36  ;;  %s1421_s25 = sshll.u32 (!%p1420_p10), %s172_s17, 5 }
  0x42   : > { %s173_s8 = scalar_lea.sflag (!%p1420_p10), [#allocation5], %s172_s17  ;;  %s1947_s10 = scalar_lea.vmem (!%p1420_p10), [#allocation4], %s1421_s25 }
  0x48   : > { %1738 = dma.done.wait (%p1850_p7), %s173_s8, 512  }
  0x49   : > { %1740 = vsyncadd (%p1850_p7), %s173_s8, 4294966784  ;;  %s182_s28 = scalar_lea.sflag [#allocation7], %s172_s17  ;;  %s1953_s11 = scalar_lea.vmem [#allocation6], %s1421_s25 }
  0x4a   : > { %1742 = dma.done.wait (%p1850_p7), %s182_s28, 512  }
  0x4b   : > { %1744 = vsyncadd (%p1850_p7), %s182_s28, 4294966784  ;;  %p218_p8 = scmp.lt.s32.totalorder %s1831_s22, 3  ;;  %s1773_s9 = smov [#allocation2]  }
  0x4c   : > { %s239_s13 = sshll.u32 %s1773_s9, 4  ;;  %s1669_s14 = scalar_lea.hbm %s2320_s0, 1024  ;;  %s1961_s13 = int_to_ptr.vmem [resolvable:$true] %s239_s13 }
  0x4d   : > { %s219_s21 = scalar_select %p218_p8, %s1831_s22, 3 }
  0x4e   : > { %p1670_p7 = scmp.ne.s32.totalorder %s2320_s0, %s1669_s14  ;;  %p2329_p2 = scmp.eq.s32.totalorder %s1831_s22, 0 }
  0x4f   : > { %s1448_s16 = sshll.u32 %s219_s21, 5  ;;  %p1675_p13 = scmp.lt.u32.totalorder %s1669_s14, %s2320_s0 }
  0x50   : > { %s1966_s30 = scalar_lea.vmem %s2321_s1, %s1448_s16  ;;  %s1971_s27 = scalar_lea.vmem %s2324_s4, %s1448_s16 }
  0x51   : > { %p1671_p9 = pnand %p1670_p7, %p2329_p2 }
  0x53   : > { %p1672_p11 = pneg %p1671_p9 }
  0x55   : > { %p1677_p0 = pnand %p1675_p13, %p1672_p11 }
  0x57   : > { %1680 = shalt.err (!%p1677_p0)  }
  0x58   : > { %s1985_s28 = scalar_lea.vmem %s1961_s13, 1024  ;;  %p2330_p5 = pmov %p2329_p2 }
  0x59   : > { %p1682_p1 = scmp.ne.s32.totalorder %s1961_s13, %s1985_s28  ;;  %p1688_p4 = scmp.lt.s32.totalorder %s1961_s13, %s1961_s13 }
  0x5a   : > { %p1689_p6 = scmp.lt.s32.totalorder %s1985_s28, %s1985_s28 }
  0x5b   : > { %p1683_p12 = pnand %p1682_p1, %p2330_p5 }
  0x5c   : > { %p1998_p10 = por %p1689_p6, %p1688_p4 }
  0x5d   : > { %p1684_p3 = pneg %p1683_p12 }
  0x5f   : > { %p1691_p8 = pnand %p1998_p10, %p1684_p3 }
  0x61   : > { %1694 = shalt.err (!%p1691_p8)  }
  0x62   : > { %p2332_p7 = pmov %p2329_p2 }
  0x64   : > { %1507 = dma.hbm_to_vmem [thread:$0]  (%p2332_p7), %s2320_s0, 1024, %s1961_s13, [#allocation3] }
  0x65   : > { %1746 = dma.done.wait (%p2329_p2), [#allocation3], 1024  ;;  %p2333_p9 = pmov %p2329_p2 }
  0x66   : > { %v1774_v0 = vmov 0.0   ;;  %v248_v1 = vld [vmem:[#allocation2 + $0x8] sm:$0xff]  ;;  %v250_v2 = vld [vmem:[#allocation2 + $0x18] sm:$0xff]  ;;  %v247_v3 = vld [vmem:[#allocation2] sm:$0xff]  ;;  %vm282_vm0 = vcmask 261120   ;;  %v259_v33 = vlaneseq  ;;  %v1775_v59 = vmov 0  }
  0x67   : > { %1748 = vsyncadd (%p2333_p9), [#allocation3], 4294966272  ;;  %359 = vmatprep.mubr.f32.mxu0 %v1774_v0  ;;  %v1450_v4 = vpack.c.bf16 %v250_v2, %v248_v1  ;;  %v249_v5 = vld [vmem:[#allocation2 + $0x10] sm:$0xff]  ;;  %v252_v6 = vld [vmem:[#allocation2 + $0x28] sm:$0xff]  ;;  %1565 = vset.pattern.permute.xlu0 %v1775_v59  ;;  %s1776_s18 = smov 1   ;;  %p1521_p11 = scmp.eq.s32.totalorder %s1831_s22, 3 }
  0x68   : > { %v254_v7 = vld [vmem:[#allocation2 + $0x38] sm:$0xff]  ;;  %v1452_v8 = vpack.c.bf16 %v249_v5, %v247_v3  ;;  %v251_v10 = vld [vmem:[#allocation2 + $0x20] sm:$0xff]  ;;  %v253_v11 = vld [vmem:[#allocation2 + $0x30] sm:$0xff]  ;;  %v260_v34 = vshrl.u32 %v259_v33, 7  ;;  %v265_v35 = vand.u32 127, %v259_v33  ;;  %1566 = vset.pattern.permute.xlu1 %v1775_v59 }
  0x69   : > { %v1454_v9 = vpack.c.bf16 %v254_v7, %v252_v6  ;;  %1451 = vmatprep.subr.bf16.mxu0 %v1450_v4  ;;  %v1456_v12 = vpack.c.bf16 %v253_v11, %v251_v10  ;;  %v278_v13 = vld [vmem:[%s1966_s30] sm:$0xff]  ;;  %v279_v14 = vld [vmem:[%s1966_s30 + $0x8] sm:$0xff]  ;;  %v280_v15 = vld [vmem:[%s1966_s30 + $0x10] sm:$0xff]  ;;  %p1697_p13 = pnand %p1682_p1, %p1521_p11 }
  0x6a   : > { %1453 = vmatpush1.bf16.msra.mxu0 %v1452_v8  ;;  %v281_v16 = vld [vmem:[%s1966_s30 + $0x18] sm:$0xff]  ;;  %vm266_vm1 = vcmp.eq.s32.totalorder %v260_v34, %v265_v35  ;;  %v261_v36 = vadd.s32 8, %v260_v34  ;;  %v262_v38 = vadd.s32 16, %v260_v34  ;;  %v263_v44 = vadd.s32 24, %v260_v34 }
  0x6b   : > { %1455 = vmatprep.subr.bf16.mxu0 %v1454_v9  ;;  %v2068_v37 = vsel %vm266_vm1, 1.0, %v1774_v0  ;;  %p1698_p0 = pneg %p1697_p13 }
  0x6c   : > { %vm267_vm2 = vcmp.eq.s32.totalorder %v261_v36, %v265_v35  ;;  %vm268_vm3 = vcmp.eq.s32.totalorder %v262_v38, %v265_v35  ;;  %vm269_vm4 = vcmp.eq.s32.totalorder %v263_v44, %v265_v35  ;;  %v2088_v36 = vld [vmem:[%s1971_s27] sm:$0xff] }
  0x6d   : > { %v2072_v42 = vsel %vm267_vm2, 1.0, %v1774_v0  ;;  %v2077_v48 = vsel %vm268_vm3, 1.0, %v1774_v0  ;;  %v2082_v53 = vsel %vm269_vm4, 1.0, %v1774_v0  ;;  %p1705_p5 = pnand %p1698_p0, %p1998_p10 }
  0x6e   : > { %1457 = vmatpush1.bf16.msra.mxu0 %v1456_v12 }
  0x71   : > { %1432 = vmatmul.mubr.msk.f32.vlgmr.msra.gmra.mrb[0].mxu0 %vm282_vm0, %v278_v13 }
  0x72   : > { %365 = vmatprep.mubr.f32.mxu0 %v1774_v0 }
  0x75   : > { %1433 = vmatmul.mubr.msk.f32.gmra.mrb[2].mxu0 %vm282_vm0, %v279_v14 }
  0x76   : > { %371 = vmatprep.mubr.f32.mxu0 %v1774_v0 }
  0x79   : > { %1434 = vmatmul.mubr.msk.f32.gmra.mrb[4].mxu0 %vm282_vm0, %v280_v15 }
  0x7a   : > { %377 = vmatprep.mubr.f32.mxu0 %v1774_v0 }
  0x7d   : > { %1435 = vmatmul.mubr.msk.f32.gmra.mrb[6].mxu0 %vm282_vm0, %v281_v16 }
  0x7e   : > { %697 = vmatprep.mubr.f32.mxu0 %v1774_v0 }
 0x144   : > { %v2027_v17 = vpop.f32.mrb[0].mxu0 }
 0x145   : > { %v2029_v18 = vpop.f32.mrb[1].mxu0 }
 0x146   : > { %464 = vmatprep.mubr.f32.mxu1 %v2029_v18  ;;  %v384_v19 = vadd.f32 %v2029_v18, %v2027_v17 }
 0x148   : > { %385 = vadd.xlane.f32.xlu0 %v384_v19  ;;  %v2034_v20 = vpop.f32.mrb[2].mxu0 }
 0x149   : > { %v2036_v21 = vpop.f32.mrb[3].mxu0  ;;  %v1460_v22 = vpack.c.bf16 %v2034_v20, %v2027_v17 }
 0x14a   : > { %v1458_v23 = vpack.c.bf16 %v2036_v21, %v2029_v18  ;;  %v387_v24 = vadd.f32 %v2036_v21, %v2034_v20 }
 0x14c   : > { %1459 = vmatprep.subr.bf16.mxu1 %v1458_v23  ;;  %388 = vadd.xlane.f32.xlu0 %v387_v24  ;;  %v2044_v25 = vpop.f32.mrb[4].mxu0 }
 0x14d   : > { %v2046_v26 = vpop.f32.mrb[5].mxu0  ;;  %1461 = vmatpush1.bf16.xpose.msra.mxu1 %v1460_v22 }
 0x14e   : > { %v390_v27 = vadd.f32 %v2046_v26, %v2044_v25 }
 0x150   : > { %391 = vadd.xlane.f32.xlu0 %v390_v27  ;;  %v2050_v28 = vpop.f32.mrb[6].mxu0 }
 0x151   : > { %v2052_v29 = vpop.f32.mrb[7].mxu0  ;;  %v1464_v30 = vpack.c.bf16 %v2050_v28, %v2044_v25 }
 0x152   : > { %v1462_v31 = vpack.c.bf16 %v2052_v29, %v2046_v26  ;;  %v393_v32 = vadd.f32 %v2052_v29, %v2050_v28 }
 0x154   : > { %1463 = vmatprep.subr.bf16.mxu1 %v1462_v31  ;;  %394 = vadd.xlane.f32.xlu1 %v393_v32 }
 0x155   : > { %1465 = vmatpush1.bf16.xpose.msra.mxu1 %v1464_v30 }
 0x15c   : > { %465 = vmatmul.mubr.f32.vlgmr.msra.gmra.mrb[0].mxu1 %v2027_v17 }
 0x15d   : > { %469 = vmatprep.mubr.f32.mxu1 %v2036_v21 }
 0x160   : > { %470 = vmatmul.mubr.f32.gmra.mrb[2].mxu1 %v2034_v20 }
 0x161   : > { %474 = vmatprep.mubr.f32.mxu1 %v2046_v26 }
 0x164   : > { %475 = vmatmul.mubr.f32.gmra.mrb[4].mxu1 %v2044_v25 }
 0x165   : > { %479 = vmatprep.mubr.f32.mxu1 %v2052_v29 }
 0x168   : > { %480 = vmatmul.mubr.f32.gmra.mrb[6].mxu1 %v2050_v28 }
 0x1d5   : > { %v386_v60 = vpop.xlane.xlu0 %385 }
 0x1d6   : > { %v396_v63 = vmul.f32 0.00390625, %v386_v60 }
 0x1d8   : > { %v505_v2 = vmul.f32 %v396_v63, %v396_v63 }
 0x1d9   : > { %v389_v61 = vpop.xlane.xlu0 %388 }
 0x1da   : > { %v397_v3 = vmul.f32 0.00390625, %v389_v61 }
 0x1dc   : > { %v506_v9 = vmul.f32 %v397_v3, %v397_v3 }
 0x1dd   : > { %v392_v4 = vpop.xlane.xlu0 %391 }
 0x1de   : > { %v398_v7 = vmul.f32 0.00390625, %v392_v4 }
 0x1e0   : > { %v507_v14 = vmul.f32 %v398_v7, %v398_v7 }
 0x1e1   : > { %v395_v62 = vpop.xlane.xlu1 %394 }
 0x1e2   : > { %v399_v16 = vmul.f32 0.00390625, %v395_v62 }
 0x1e4   : > { %v508_v30 = vmul.f32 %v399_v16, %v399_v16 }
 0x22f   : > { %v466_v39 = vpop.f32.mrb[0].mxu1 }
 0x230   : > { %v485_v40 = vmul.f32 %v2068_v37, %v466_v39  ;;  %v468_v41 = vpop.f32.mrb[1].mxu1 }
 0x231   : > { %v2092_v41 = vld [vmem:[%s1971_s27 + $0x8] sm:$0xff] }
 0x232   : > { %v489_v43 = vsel %vm282_vm0, %v485_v40, 0.0 }
 0x233   : > { %v471_v45 = vpop.f32.mrb[2].mxu1  ;;  %490 = vadd.xlane.f32.xlu1 %v489_v43 }
 0x234   : > { %v486_v46 = vmul.f32 %v2072_v42, %v471_v45  ;;  %v473_v47 = vpop.f32.mrb[3].mxu1 }
 0x236   : > { %v492_v49 = vsel %vm282_vm0, %v486_v46, 0.0  ;;  %v2097_v46 = vld [vmem:[%s1971_s27 + $0x10] sm:$0xff] }
 0x237   : > { %v476_v50 = vpop.f32.mrb[4].mxu1  ;;  %493 = vadd.xlane.f32.xlu1 %v492_v49 }
 0x238   : > { %v487_v51 = vmul.f32 %v2077_v48, %v476_v50  ;;  %v478_v52 = vpop.f32.mrb[5].mxu1 }
 0x23a   : > { %v495_v54 = vsel %vm282_vm0, %v487_v51, 0.0  ;;  %v2102_v51 = vld [vmem:[%s1971_s27 + $0x18] sm:$0xff] }
 0x23b   : > { %496 = vadd.xlane.f32.xlu0 %v495_v54  ;;  %v481_v55 = vpop.f32.mrb[6].mxu1 }
 0x23c   : > { %v488_v56 = vmul.f32 %v2082_v53, %v481_v55  ;;  %v483_v57 = vpop.f32.mrb[7].mxu1 }
 0x23e   : > { %v498_v58 = vsel %vm282_vm0, %v488_v56, 0.0  ;;  %v1777_v56 = vmov 1  }
 0x23f   : > { %499 = vadd.xlane.f32.xlu1 %v498_v58 }
 0x2c0   : > { %v491_v1 = vpop.xlane.xlu1 %490 }
 0x2c1   : > { %v501_v5 = vmul.f32 0.00390625, %v491_v1 }
 0x2c3   : > { %v509_v6 = vsub.f32 %v501_v5, %v505_v2 }
 0x2c4   : > { %v494_v8 = vpop.xlane.xlu1 %493 }
 0x2c5   : > { %v513_v10 = vmax.f32 %v509_v6, 0.0  ;;  %v502_v11 = vmul.f32 0.00390625, %v494_v8 }
 0x2c7   : > { %v517_v12 = vadd.f32 1e-05, %v513_v10  ;;  %v510_v13 = vsub.f32 %v502_v11, %v506_v9 }
 0x2c8   : > { %v497_v15 = vpop.xlane.xlu0 %496 }
 0x2c9   : > { %1577 = vrsqrt.f32 %v517_v12  ;;  %v514_v19 = vmax.f32 %v510_v13, 0.0  ;;  %v503_v22 = vmul.f32 0.00390625, %v497_v15 }
 0x2cb   : > { %v518_v23 = vadd.f32 1e-05, %v514_v19  ;;  %v511_v24 = vsub.f32 %v503_v22, %v507_v14 }
 0x2cc   : > { %v500_v27 = vpop.xlane.xlu1 %499 }
 0x2cd   : > { %1579 = vrsqrt.f32 %v518_v23  ;;  %v515_v31 = vmax.f32 %v511_v24, 0.0  ;;  %v504_v32 = vmul.f32 0.00390625, %v500_v27 }
 0x2cf   : > { %v519_v33 = vadd.f32 1e-05, %v515_v31  ;;  %v512_v34 = vsub.f32 %v504_v32, %v508_v30 }
 0x2d1   : > { %1581 = vrsqrt.f32 %v519_v33  ;;  %v516_v35 = vmax.f32 %v512_v34, 0.0 }
 0x2d3   : > { %v1578_v38 = vpop.eup %1577  ;;  %v520_v39 = vadd.f32 1e-05, %v516_v35 }
 0x2d4   : > { %v525_v40 = vmul.f32 %v1578_v38, %v2088_v36 }
 0x2d5   : > { %1583 = vrsqrt.f32 %v520_v39 }
 0x2d6   : > { %v557_v43 = vmul.f32 %v525_v40, %v396_v63 }
 0x2d7   : > { %v1580_v44 = vpop.eup %1579 }
 0x2d8   : > { %565 = vrot.lane.b32.xlu0 %v557_v43, %s1776_s18  ;;  %v526_v45 = vmul.f32 %v1580_v44, %v2092_v41 }
 0x2da   : > { %v558_v47 = vmul.f32 %v526_v45, %v397_v3 }
 0x2db   : > { %v1582_v49 = vpop.eup %1581 }
 0x2dc   : > { %531 = vperm.xlu0 %1565, %v525_v40   ;;  %567 = vrot.lane.b32.xlu1 %v558_v47, %s1776_s18  ;;  %v527_v50 = vmul.f32 %v1582_v49, %v2097_v46  ;;  %v620_v47 = vld [vmem:[%s1947_s10 + $0x18] sm:$0xff] }
 0x2de   : > { %v559_v52 = vmul.f32 %v527_v50, %v398_v7 }
 0x2df   : > { %v1584_v54 = vpop.eup %1583 }
 0x2e0   : > { %569 = vrot.lane.b32.xlu1 %v559_v52, %s1776_s18  ;;  %v528_v55 = vmul.f32 %v1584_v54, %v2102_v51  ;;  %1568 = vset.pattern.permute.xlu0 %v1777_v56 }
 0x2e2   : > { %v560_v57 = vmul.f32 %v528_v55, %v399_v16 }
 0x2e4   : > { %571 = vrot.lane.b32.xlu1 %v560_v57, %s1776_s18 }
 0x2e8   : > { %536 = vperm.xlu1 %1566, %v526_v45   ;;  %v619_v45 = vld [vmem:[%s1947_s10 + $0x10] sm:$0xff] }
 0x2ec   : > { %541 = vperm.xlu1 %1566, %v527_v50  }
 0x2f0   : > { %546 = vperm.xlu1 %1566, %v528_v55  }
 0x2f4   : > { %1567 = vset.pattern.permute.xlu1 %v1777_v56 }
 0x34a   : > { %v566_v58 = vpop.permute.xlu0 %565 }
 0x34b   : > { %v577_v59 = vsub.f32 %v2088_v36, %v566_v58 }
 0x34d   : > { %583 = vperm.xlu1 %1567, %v577_v59  }
 0x34e   : > { %v568_v60 = vpop.permute.xlu1 %567 }
 0x34f   : > { %v578_v61 = vsub.f32 %v2092_v41, %v568_v60 }
 0x351   : > { %588 = vperm.xlu0 %1568, %v578_v61  }
 0x352   : > { %v570_v62 = vpop.permute.xlu1 %569 }
 0x353   : > { %v579_v63 = vsub.f32 %v2097_v46, %v570_v62 }
 0x355   : > { %593 = vperm.xlu0 %1568, %v579_v63  }
 0x356   : > { %v572_v1 = vpop.permute.xlu1 %571 }
 0x357   : > { %v580_v2 = vsub.f32 %v2102_v51, %v572_v1 }
 0x359   : > { %598 = vperm.xlu1 %1567, %v580_v2  }
 0x35b   : > { %v532_v6 = vpop.permute.xlu0 %531 }
 0x35c   : > { %v549_v8 = vmul.f32 %v532_v6, %v2027_v17  ;;  %v550_v9 = vmul.f32 %v532_v6, %v2029_v18 }
 0x367   : > { %v537_v3 = vpop.permute.xlu1 %536 }
 0x368   : > { %v551_v10 = vmul.f32 %v537_v3, %v2034_v20  ;;  %v552_v11 = vmul.f32 %v537_v3, %v2036_v21 }
 0x36b   : > { %v542_v4 = vpop.permute.xlu1 %541 }
 0x36c   : > { %v553_v30 = vmul.f32 %v542_v4, %v2044_v25  ;;  %v554_v17 = vmul.f32 %v542_v4, %v2046_v26 }
 0x36f   : > { %v547_v5 = vpop.permute.xlu1 %546 }
 0x370   : > { %v555_v20 = vmul.f32 %v547_v5, %v2050_v28  ;;  %v556_v21 = vmul.f32 %v547_v5, %v2052_v29  ;;  %v617_v28 = vld [vmem:[%s1947_s10] sm:$0xff]  ;;  %v618_v29 = vld [vmem:[%s1947_s10 + $0x8] sm:$0xff] }
 0x3cc   : > { %v584_v7 = vpop.permute.xlu1 %583 }
 0x3cd   : > { %v601_v12 = vadd.f32 %v584_v7, %v549_v8  ;;  %v602_v13 = vadd.f32 %v584_v7, %v550_v9 }
 0x3cf   : > { %v609_v19 = vmax.f32 %v601_v12, 0.0  ;;  %v610_v22 = vmax.f32 %v602_v13, 0.0 }
 0x3d0   : > { %v589_v14 = vpop.permute.xlu0 %588 }
 0x3d1   : > { %v603_v15 = vadd.f32 %v589_v14, %v551_v10  ;;  %v604_v16 = vadd.f32 %v589_v14, %v552_v11 }
 0x3d3   : > { %v611_v23 = vmax.f32 %v603_v15, 0.0  ;;  %v612_v24 = vmax.f32 %v604_v16, 0.0 }
 0x3d4   : > { %v594_v27 = vpop.permute.xlu0 %593 }
 0x3d5   : > { %v1468_v31 = vpack.c.bf16 %v611_v23, %v609_v19  ;;  %v1466_v18 = vpack.c.bf16 %v612_v24, %v610_v22  ;;  %v605_v32 = vadd.f32 %v594_v27, %v553_v30  ;;  %v606_v33 = vadd.f32 %v594_v27, %v554_v17 }
 0x3d6   : > { %v1778_v24 = vmov 2  }
 0x3d7   : > { %1467 = vmatprep.subr.bf16.mxu0 %v1466_v18  ;;  %v613_v39 = vmax.f32 %v605_v32, 0.0  ;;  %v614_v25 = vmax.f32 %v606_v33, 0.0  ;;  %1569 = vset.pattern.permute.xlu0 %v1778_v24 }
 0x3d8   : > { %1469 = vmatpush1.bf16.msra.mxu0 %v1468_v31  ;;  %v599_v34 = vpop.permute.xlu1 %598  ;;  %1570 = vset.pattern.permute.xlu1 %v1778_v24 }
 0x3d9   : > { %v607_v35 = vadd.f32 %v599_v34, %v555_v20  ;;  %v608_v38 = vadd.f32 %v599_v34, %v556_v21 }
 0x3db   : > { %v615_v26 = vmax.f32 %v607_v35, 0.0  ;;  %v616_v40 = vmax.f32 %v608_v38, 0.0 }
 0x3dd   : > { %v1472_v43 = vpack.c.bf16 %v615_v26, %v613_v39  ;;  %v1470_v44 = vpack.c.bf16 %v616_v40, %v614_v25 }
 0x3df   : > { %1471 = vmatprep.subr.bf16.mxu0 %v1470_v44 }
 0x3e0   : > { %1473 = vmatpush1.bf16.msra.mxu0 %v1472_v43 }
 0x3e3   : > { %1436 = vmatmul.mubr.msk.f32.vlgmr.msra.gmra.mrb[8].mxu0 %vm282_vm0, %v617_v28 }
 0x3e4   : > { %703 = vmatprep.mubr.f32.mxu0 %v1774_v0 }
 0x3e7   : > { %1437 = vmatmul.mubr.msk.f32.gmra.mrb[10].mxu0 %vm282_vm0, %v618_v29 }
 0x3e8   : > { %709 = vmatprep.mubr.f32.mxu0 %v1774_v0 }
 0x3eb   : > { %1438 = vmatmul.mubr.msk.f32.gmra.mrb[12].mxu0 %vm282_vm0, %v619_v45 }
 0x3ec   : > { %715 = vmatprep.mubr.f32.mxu0 %v1774_v0 }
 0x3ef   : > { %1439 = vmatmul.mubr.msk.f32.gmra.mrb[14].mxu0 %vm282_vm0, %v620_v47 }
 0x3f0   : > { %1035 = vmatprep.mubr.f32.mxu0 %v1774_v0 }
 0x4b6   : > { %v2131_v49 = vpop.f32.mrb[8].mxu0 }
 0x4b7   : > { %v2133_v50 = vpop.f32.mrb[9].mxu0 }
 0x4b8   : > { %802 = vmatprep.mubr.f32.mxu1 %v2133_v50  ;;  %v722_v52 = vadd.f32 %v2133_v50, %v2131_v49 }
 0x4ba   : > { %723 = vadd.xlane.f32.xlu0 %v722_v52  ;;  %v2138_v54 = vpop.f32.mrb[10].mxu0 }
 0x4bb   : > { %v1476_v55 = vpack.c.bf16 %v2138_v54, %v2131_v49  ;;  %v2142_v56 = vpop.f32.mrb[11].mxu0 }
 0x4bc   : > { %v1474_v57 = vpack.c.bf16 %v2142_v56, %v2133_v50  ;;  %v725_v58 = vadd.f32 %v2142_v56, %v2138_v54 }
 0x4be   : > { %1475 = vmatprep.subr.bf16.mxu1 %v1474_v57  ;;  %726 = vadd.xlane.f32.xlu1 %v725_v58  ;;  %v2148_v59 = vpop.f32.mrb[12].mxu0 }
 0x4bf   : > { %v2150_v60 = vpop.f32.mrb[13].mxu0  ;;  %1477 = vmatpush1.bf16.xpose.msra.mxu1 %v1476_v55 }
 0x4c0   : > { %v728_v61 = vadd.f32 %v2150_v60, %v2148_v59 }
 0x4c2   : > { %729 = vadd.xlane.f32.xlu0 %v728_v61  ;;  %v2154_v62 = vpop.f32.mrb[14].mxu0 }
 0x4c3   : > { %v1480_v63 = vpack.c.bf16 %v2154_v62, %v2148_v59  ;;  %v2158_v1 = vpop.f32.mrb[15].mxu0 }
 0x4c4   : > { %v1478_v2 = vpack.c.bf16 %v2158_v1, %v2150_v60  ;;  %v731_v3 = vadd.f32 %v2158_v1, %v2154_v62 }
 0x4c6   : > { %1479 = vmatprep.subr.bf16.mxu1 %v1478_v2  ;;  %732 = vadd.xlane.f32.xlu1 %v731_v3 }
 0x4c7   : > { %1481 = vmatpush1.bf16.xpose.msra.mxu1 %v1480_v63 }
 0x4ce   : > { %803 = vmatmul.mubr.f32.vlgmr.msra.gmra.mrb[8].mxu1 %v2131_v49 }
 0x4cf   : > { %807 = vmatprep.mubr.f32.mxu1 %v2142_v56 }
 0x4d2   : > { %808 = vmatmul.mubr.f32.gmra.mrb[10].mxu1 %v2138_v54 }
 0x4d3   : > { %812 = vmatprep.mubr.f32.mxu1 %v2150_v60 }
 0x4d6   : > { %813 = vmatmul.mubr.f32.gmra.mrb[12].mxu1 %v2148_v59 }
 0x4d7   : > { %817 = vmatprep.mubr.f32.mxu1 %v2158_v1 }
 0x4da   : > { %818 = vmatmul.mubr.f32.gmra.mrb[14].mxu1 %v2154_v62 }
 0x547   : > { %v724_v27 = vpop.xlane.xlu0 %723 }
 0x548   : > { %v734_v17 = vmul.f32 0.00390625, %v724_v27 }
 0x54a   : > { %v843_v20 = vmul.f32 %v734_v17, %v734_v17 }
 0x54b   : > { %v727_v31 = vpop.xlane.xlu1 %726 }
 0x54c   : > { %v735_v21 = vmul.f32 0.00390625, %v727_v31 }
 0x54e   : > { %v844_v38 = vmul.f32 %v735_v21, %v735_v21 }
 0x54f   : > { %v730_v30 = vpop.xlane.xlu0 %729 }
 0x550   : > { %v736_v34 = vmul.f32 0.00390625, %v730_v30 }
 0x552   : > { %v845_v44 = vmul.f32 %v736_v34, %v736_v34 }
 0x553   : > { %v733_v26 = vpop.xlane.xlu1 %732 }
 0x554   : > { %v737_v29 = vmul.f32 0.00390625, %v733_v26 }
 0x556   : > { %v846_v58 = vmul.f32 %v737_v29, %v737_v29 }
 0x5a1   : > { %v804_v4 = vpop.f32.mrb[8].mxu1 }
 0x5a2   : > { %v823_v5 = vmul.f32 %v2068_v37, %v804_v4  ;;  %v806_v6 = vpop.f32.mrb[9].mxu1 }
 0x5a4   : > { %v827_v7 = vsel %vm282_vm0, %v823_v5, 0.0 }
 0x5a5   : > { %828 = vadd.xlane.f32.xlu0 %v827_v7  ;;  %v809_v8 = vpop.f32.mrb[10].mxu1 }
 0x5a6   : > { %v824_v9 = vmul.f32 %v2072_v42, %v809_v8  ;;  %v811_v10 = vpop.f32.mrb[11].mxu1 }
 0x5a8   : > { %v830_v11 = vsel %vm282_vm0, %v824_v9, 0.0 }
 0x5a9   : > { %831 = vadd.xlane.f32.xlu0 %v830_v11  ;;  %v814_v12 = vpop.f32.mrb[12].mxu1 }
 0x5aa   : > { %v825_v13 = vmul.f32 %v2077_v48, %v814_v12  ;;  %v816_v14 = vpop.f32.mrb[13].mxu1 }
 0x5ac   : > { %v833_v15 = vsel %vm282_vm0, %v825_v13, 0.0 }
 0x5ad   : > { %834 = vadd.xlane.f32.xlu0 %v833_v15  ;;  %v819_v16 = vpop.f32.mrb[14].mxu1 }
 0x5ae   : > { %v826_v19 = vmul.f32 %v2082_v53, %v819_v16  ;;  %v821_v22 = vpop.f32.mrb[15].mxu1 }
 0x5b0   : > { %v836_v23 = vsel %vm282_vm0, %v826_v19, 0.0  ;;  %v1779_v19 = vmov 3  }
 0x5b1   : > { %837 = vadd.xlane.f32.xlu1 %v836_v23 }
 0x632   : > { %v829_v18 = vpop.xlane.xlu0 %828 }
 0x633   : > { %v839_v32 = vmul.f32 0.00390625, %v829_v18 }
 0x635   : > { %v847_v33 = vsub.f32 %v839_v32, %v843_v20 }
 0x636   : > { %v832_v35 = vpop.xlane.xlu0 %831 }
 0x637   : > { %v851_v39 = vmax.f32 %v847_v33, 0.0  ;;  %v840_v25 = vmul.f32 0.00390625, %v832_v35 }
 0x639   : > { %v855_v40 = vadd.f32 1e-05, %v851_v39  ;;  %v848_v43 = vsub.f32 %v840_v25, %v844_v38 }
 0x63a   : > { %v835_v28 = vpop.xlane.xlu0 %834 }
 0x63b   : > { %1585 = vrsqrt.f32 %v855_v40  ;;  %v852_v45 = vmax.f32 %v848_v43, 0.0  ;;  %v841_v47 = vmul.f32 0.00390625, %v835_v28 }
 0x63d   : > { %v856_v52 = vadd.f32 1e-05, %v852_v45  ;;  %v849_v55 = vsub.f32 %v841_v47, %v845_v44 }
 0x63e   : > { %v838_v57 = vpop.xlane.xlu1 %837 }
 0x63f   : > { %1587 = vrsqrt.f32 %v856_v52  ;;  %v853_v61 = vmax.f32 %v849_v55, 0.0  ;;  %v842_v63 = vmul.f32 0.00390625, %v838_v57 }
 0x641   : > { %v857_v2 = vadd.f32 1e-05, %v853_v61  ;;  %v850_v3 = vsub.f32 %v842_v63, %v846_v58 }
 0x643   : > { %1589 = vrsqrt.f32 %v857_v2  ;;  %v854_v4 = vmax.f32 %v850_v3, 0.0 }
 0x645   : > { %v1586_v5 = vpop.eup %1585  ;;  %v858_v6 = vadd.f32 1e-05, %v854_v4 }
 0x646   : > { %v863_v7 = vmul.f32 %v1586_v5, %v2088_v36 }
 0x647   : > { %1591 = vrsqrt.f32 %v858_v6 }
 0x648   : > { %v895_v8 = vmul.f32 %v863_v7, %v734_v17 }
 0x649   : > { %v1588_v9 = vpop.eup %1587 }
 0x64a   : > { %903 = vrot.lane.b32.xlu0 %v895_v8, %s1776_s18  ;;  %v864_v10 = vmul.f32 %v1588_v9, %v2092_v41 }
 0x64c   : > { %v896_v11 = vmul.f32 %v864_v10, %v735_v21 }
 0x64d   : > { %v1590_v12 = vpop.eup %1589 }
 0x64e   : > { %869 = vperm.xlu0 %1569, %v863_v7   ;;  %905 = vrot.lane.b32.xlu1 %v896_v11, %s1776_s18  ;;  %v865_v13 = vmul.f32 %v1590_v12, %v2097_v46  ;;  %v958_v11 = vld [vmem:[%s1953_s11 + $0x18] sm:$0xff] }
 0x650   : > { %v897_v14 = vmul.f32 %v865_v13, %v736_v34 }
 0x651   : > { %v1592_v15 = vpop.eup %1591 }
 0x652   : > { %907 = vrot.lane.b32.xlu1 %v897_v14, %s1776_s18  ;;  %v866_v16 = vmul.f32 %v1592_v15, %v2102_v51  ;;  %1572 = vset.pattern.permute.xlu0 %v1779_v19 }
 0x654   : > { %v898_v22 = vmul.f32 %v866_v16, %v737_v29 }
 0x656   : > { %909 = vrot.lane.b32.xlu1 %v898_v22, %s1776_s18 }
 0x65a   : > { %874 = vperm.xlu1 %1570, %v864_v10   ;;  %v957_v10 = vld [vmem:[%s1953_s11 + $0x10] sm:$0xff] }
 0x65e   : > { %879 = vperm.xlu1 %1570, %v865_v13  }
 0x662   : > { %884 = vperm.xlu1 %1570, %v866_v16  }
 0x666   : > { %1571 = vset.pattern.permute.xlu1 %v1779_v19 }
 0x6bc   : > { %v904_v23 = vpop.permute.xlu0 %903 }
 0x6bd   : > { %v915_v24 = vsub.f32 %v2088_v36, %v904_v23 }
 0x6bf   : > { %921 = vperm.xlu1 %1571, %v915_v24  }
 0x6c0   : > { %v906_v27 = vpop.permute.xlu1 %905 }
 0x6c1   : > { %v916_v30 = vsub.f32 %v2092_v41, %v906_v27 }
 0x6c3   : > { %926 = vperm.xlu0 %1572, %v916_v30  }
 0x6c4   : > { %v908_v17 = vpop.permute.xlu1 %907 }
 0x6c5   : > { %v917_v31 = vsub.f32 %v2097_v46, %v908_v17 }
 0x6c7   : > { %931 = vperm.xlu0 %1572, %v917_v31  }
 0x6c8   : > { %v910_v18 = vpop.permute.xlu1 %909 }
 0x6c9   : > { %v918_v20 = vsub.f32 %v2102_v51, %v910_v18 }
 0x6cb   : > { %936 = vperm.xlu1 %1571, %v918_v20  }
 0x6cd   : > { %v870_v34 = vpop.permute.xlu0 %869 }
 0x6ce   : > { %v887_v38 = vmul.f32 %v870_v34, %v2131_v49  ;;  %v888_v39 = vmul.f32 %v870_v34, %v2133_v50 }
 0x6d9   : > { %v875_v21 = vpop.permute.xlu1 %874 }
 0x6da   : > { %v889_v25 = vmul.f32 %v875_v21, %v2138_v54  ;;  %v890_v26 = vmul.f32 %v875_v21, %v2142_v56 }
 0x6dd   : > { %v880_v32 = vpop.permute.xlu1 %879 }
 0x6de   : > { %v891_v58 = vmul.f32 %v880_v32, %v2148_v59  ;;  %v892_v49 = vmul.f32 %v880_v32, %v2150_v60 }
 0x6e1   : > { %v885_v33 = vpop.permute.xlu1 %884 }
 0x6e2   : > { %v893_v54 = vmul.f32 %v885_v33, %v2154_v62  ;;  %v894_v56 = vmul.f32 %v885_v33, %v2158_v1  ;;  %v955_v62 = vld [vmem:[%s1953_s11] sm:$0xff]  ;;  %v956_v1 = vld [vmem:[%s1953_s11 + $0x8] sm:$0xff] }
 0x73e   : > { %v922_v35 = vpop.permute.xlu1 %921 }
 0x73f   : > { %v939_v40 = vadd.f32 %v922_v35, %v887_v38  ;;  %v940_v43 = vadd.f32 %v922_v35, %v888_v39 }
 0x741   : > { %v947_v45 = vmax.f32 %v939_v40, 0.0  ;;  %v948_v47 = vmax.f32 %v940_v43, 0.0 }
 0x742   : > { %v927_v44 = vpop.permute.xlu0 %926 }
 0x743   : > { %v941_v28 = vadd.f32 %v927_v44, %v889_v25  ;;  %v942_v29 = vadd.f32 %v927_v44, %v890_v26 }
 0x745   : > { %v949_v52 = vmax.f32 %v941_v28, 0.0  ;;  %v950_v55 = vmax.f32 %v942_v29, 0.0 }
 0x746   : > { %v932_v57 = vpop.permute.xlu0 %931 }
 0x747   : > { %v1484_v61 = vpack.c.bf16 %v949_v52, %v947_v45  ;;  %v1482_v50 = vpack.c.bf16 %v950_v55, %v948_v47  ;;  %v943_v63 = vadd.f32 %v932_v57, %v891_v58  ;;  %v944_v2 = vadd.f32 %v932_v57, %v892_v49 }
 0x748   : > { %v1780_v45 = vmov 4  }
 0x749   : > { %1483 = vmatprep.subr.bf16.mxu0 %v1482_v50  ;;  %v951_v6 = vmax.f32 %v943_v63, 0.0  ;;  %v952_v59 = vmax.f32 %v944_v2, 0.0  ;;  %1573 = vset.pattern.permute.xlu0 %v1780_v45 }
 0x74a   : > { %1485 = vmatpush1.bf16.msra.mxu0 %v1484_v61  ;;  %v937_v3 = vpop.permute.xlu1 %936  ;;  %1574 = vset.pattern.permute.xlu1 %v1780_v45 }
 0x74b   : > { %v945_v4 = vadd.f32 %v937_v3, %v893_v54  ;;  %v946_v5 = vadd.f32 %v937_v3, %v894_v56 }
 0x74d   : > { %v953_v60 = vmax.f32 %v945_v4, 0.0  ;;  %v954_v7 = vmax.f32 %v946_v5, 0.0 }
 0x74f   : > { %v1488_v8 = vpack.c.bf16 %v953_v60, %v951_v6  ;;  %v1486_v9 = vpack.c.bf16 %v954_v7, %v952_v59 }
 0x751   : > { %1487 = vmatprep.subr.bf16.mxu0 %v1486_v9 }
 0x752   : > { %1489 = vmatpush1.bf16.msra.mxu0 %v1488_v8 }
 0x755   : > { %1440 = vmatmul.mubr.msk.f32.vlgmr.msra.gmra.mrb[16].mxu0 %vm282_vm0, %v955_v62 }
 0x756   : > { %1041 = vmatprep.mubr.f32.mxu0 %v1774_v0 }
 0x759   : > { %1441 = vmatmul.mubr.msk.f32.gmra.mrb[18].mxu0 %vm282_vm0, %v956_v1 }
 0x75a   : > { %1047 = vmatprep.mubr.f32.mxu0 %v1774_v0 }
 0x75d   : > { %1442 = vmatmul.mubr.msk.f32.gmra.mrb[20].mxu0 %vm282_vm0, %v957_v10 }
 0x75e   : > { %1053 = vmatprep.mubr.f32.mxu0 %v1774_v0 }
 0x761   : > { %1443 = vmatmul.mubr.msk.f32.gmra.mrb[22].mxu0 %vm282_vm0, %v958_v11 }
 0x828   : > { %v2210_v12 = vpop.f32.mrb[16].mxu0 }
 0x829   : > { %v2212_v13 = vpop.f32.mrb[17].mxu0 }
 0x82a   : > { %1140 = vmatprep.mubr.f32.mxu0 %v2212_v13  ;;  %v1060_v14 = vadd.f32 %v2212_v13, %v2210_v12 }
 0x82c   : > { %v2217_v15 = vpop.f32.mrb[18].mxu0  ;;  %1061 = vadd.xlane.f32.xlu0 %v1060_v14 }
 0x82d   : > { %v1492_v16 = vpack.c.bf16 %v2217_v15, %v2210_v12  ;;  %v2221_v19 = vpop.f32.mrb[19].mxu0 }
 0x82e   : > { %v1490_v0 = vpack.c.bf16 %v2221_v19, %v2212_v13  ;;  %1145 = vmatprep.mubr.f32.mxu1 %v2221_v19  ;;  %v1063_v22 = vadd.f32 %v2221_v19, %v2217_v15 }
 0x830   : > { %1491 = vmatprep.subr.bf16.mxu0 %v1490_v0  ;;  %1498 = vmatprep.subr.bf16.mxu1 %v1490_v0  ;;  %v2228_v23 = vpop.f32.mrb[20].mxu0 }
 0x831   : > { %1493 = vmatpush1.bf16.xpose.msra.mxu0 %v1492_v16  ;;  %1500 = vmatpush1.bf16.xpose.msra.mxu1 %v1492_v16  ;;  %v2230_v24 = vpop.f32.mrb[21].mxu0 }
 0x832   : > { %1064 = vadd.xlane.f32.xlu1 %v1063_v22  ;;  %v1066_v27 = vadd.f32 %v2230_v24, %v2228_v23 }
 0x834   : > { %v2234_v30 = vpop.f32.mrb[22].mxu0  ;;  %1067 = vadd.xlane.f32.xlu0 %v1066_v27 }
 0x835   : > { %v1496_v17 = vpack.c.bf16 %v2234_v30, %v2228_v23  ;;  %v2238_v31 = vpop.f32.mrb[23].mxu0 }
 0x836   : > { %v1494_v18 = vpack.c.bf16 %v2238_v31, %v2230_v24  ;;  %v1069_v20 = vadd.f32 %v2238_v31, %v2234_v30 }
 0x838   : > { %1495 = vmatprep.subr.bf16.mxu0 %v1494_v18  ;;  %1499 = vmatprep.subr.bf16.mxu1 %v1494_v18 }
 0x839   : > { %1497 = vmatpush1.bf16.xpose.msra.mxu0 %v1496_v17  ;;  %1501 = vmatpush1.bf16.xpose.msra.mxu1 %v1496_v17 }
 0x83a   : > { %1070 = vadd.xlane.f32.xlu0 %v1069_v20 }
 0x840   : > { %1141 = vmatmul.mubr.f32.vlgmr.msra.gmra.mrb[24].mxu0 %v2210_v12  ;;  %1146 = vmatmul.mubr.f32.vlgmr.msra.gmra.mrb[16].mxu1 %v2217_v15 }
 0x841   : > { %1150 = vmatprep.mubr.f32.mxu1 %v2230_v24 }
 0x844   : > { %1151 = vmatmul.mubr.f32.gmra.mrb[18].mxu1 %v2228_v23 }
 0x845   : > { %1155 = vmatprep.mubr.f32.mxu1 %v2238_v31 }
 0x848   : > { %1156 = vmatmul.mubr.f32.gmra.mrb[20].mxu1 %v2234_v30 }
 0x8b9   : > { %v1062_v47 = vpop.xlane.xlu0 %1061 }
 0x8ba   : > { %v1072_v58 = vmul.f32 0.00390625, %v1062_v47 }
 0x8bc   : > { %v1181_v54 = vmul.f32 %v1072_v58, %v1072_v58 }
 0x8bf   : > { %v1065_v55 = vpop.xlane.xlu1 %1064 }
 0x8c1   : > { %v1068_v52 = vpop.xlane.xlu0 %1067 }
 0x8c2   : > { %v1074_v49 = vmul.f32 0.00390625, %v1068_v52 }
 0x8c4   : > { %v1183_v4 = vmul.f32 %v1074_v49, %v1074_v49 }
 0x8c7   : > { %v1071_v57 = vpop.xlane.xlu0 %1070 }
 0x8c8   : > { %v1075_v6 = vmul.f32 0.00390625, %v1071_v57 }
 0x8ca   : > { %v1184_v10 = vmul.f32 %v1075_v6, %v1075_v6 }
 0x913   : > { %v1142_v21 = vpop.f32.mrb[24].mxu0  ;;  %v1147_v32 = vpop.f32.mrb[16].mxu1 }
 0x914   : > { %v1161_v33 = vmul.f32 %v2068_v37, %v1142_v21  ;;  %v1162_v34 = vmul.f32 %v2072_v42, %v1147_v32  ;;  %v1144_v35 = vpop.f32.mrb[25].mxu0  ;;  %v1149_v38 = vpop.f32.mrb[17].mxu1 }
 0x916   : > { %v1168_v39 = vsel %vm282_vm0, %v1162_v34, 0.0  ;;  %v1165_v25 = vsel %vm282_vm0, %v1161_v33, 0.0 }
 0x917   : > { %1169 = vadd.xlane.f32.xlu1 %v1168_v39  ;;  %v1152_v26 = vpop.f32.mrb[18].mxu1  ;;  %1166 = vadd.xlane.f32.xlu0 %v1165_v25 }
 0x918   : > { %v1163_v40 = vmul.f32 %v2077_v48, %v1152_v26  ;;  %v1154_v43 = vpop.f32.mrb[19].mxu1  ;;  %v1073_v48 = vmul.f32 0.00390625, %v1065_v55 }
 0x91a   : > { %v1171_v44 = vsel %vm282_vm0, %v1163_v40, 0.0  ;;  %v1182_v56 = vmul.f32 %v1073_v48, %v1073_v48  ;;  %v1781_v40 = vmov 5  }
 0x91b   : > { %v1157_v28 = vpop.f32.mrb[20].mxu1  ;;  %1172 = vadd.xlane.f32.xlu0 %v1171_v44 }
 0x91c   : > { %v1164_v37 = vmul.f32 %v2082_v53, %v1157_v28  ;;  %v1159_v29 = vpop.f32.mrb[21].mxu1 }
 0x91e   : > { %v1174_v42 = vsel %vm282_vm0, %v1164_v37, 0.0 }
 0x91f   : > { %1175 = vadd.xlane.f32.xlu1 %v1174_v42 }
 0x9a4   : > { %v1170_v61 = vpop.xlane.xlu1 %1169  ;;  %v1167_v50 = vpop.xlane.xlu0 %1166 }
 0x9a5   : > { %v1178_v63 = vmul.f32 0.00390625, %v1170_v61  ;;  %v1177_v53 = vmul.f32 0.00390625, %v1167_v50 }
 0x9a7   : > { %v1186_v2 = vsub.f32 %v1178_v63, %v1182_v56  ;;  %v1185_v3 = vsub.f32 %v1177_v53, %v1181_v54 }
 0x9a8   : > { %v1173_v5 = vpop.xlane.xlu0 %1172 }
 0x9a9   : > { %v1190_v59 = vmax.f32 %v1186_v2, 0.0  ;;  %v1189_v60 = vmax.f32 %v1185_v3, 0.0  ;;  %v1179_v7 = vmul.f32 0.00390625, %v1173_v5  ;;  %v1602_v2 = vld [vmem:[#allocation2 + $0x18] sm:$0xff]  ;;  %v1603_v5 = vld [vmem:[#allocation2] sm:$0xff] }
 0x9ab   : > { %v1194_v8 = vadd.f32 1e-05, %v1190_v59  ;;  %v1193_v9 = vadd.f32 1e-05, %v1189_v60  ;;  %v1187_v62 = vsub.f32 %v1179_v7, %v1183_v4 }
 0x9ac   : > { %v1176_v1 = vpop.xlane.xlu1 %1175 }
 0x9ad   : > { %1593 = vrsqrt.f32 %v1194_v8  ;;  %v1191_v11 = vmax.f32 %v1187_v62, 0.0  ;;  %v1180_v14 = vmul.f32 0.00390625, %v1176_v1 }
 0x9ae   : > { %1595 = vrsqrt.f32 %v1193_v9 }
 0x9af   : > { %v1195_v16 = vadd.f32 1e-05, %v1191_v11  ;;  %v1188_v0 = vsub.f32 %v1180_v14, %v1184_v10  ;;  %v1606_v11 = vld [vmem:[#allocation2 + $0x28] sm:$0xff] }
 0x9b1   : > { %1597 = vrsqrt.f32 %v1195_v16  ;;  %v1192_v22 = vmax.f32 %v1188_v0, 0.0 }
 0x9b3   : > { %v1196_v27 = vadd.f32 1e-05, %v1192_v22 }
 0x9b5   : > { %1599 = vrsqrt.f32 %v1196_v27 }
 0x9b7   : > { %v1594_v17 = vpop.eup %1593 }
 0x9b8   : > { %v1596_v18 = vpop.eup %1595  ;;  %v1202_v20 = vmul.f32 %v1594_v17, %v2092_v41 }
 0x9b9   : > { %v1201_v21 = vmul.f32 %v1596_v18, %v2088_v36  ;;  %v1608_v18 = vld [vmem:[#allocation2 + $0x38] sm:$0xff] }
 0x9ba   : > { %v1234_v32 = vmul.f32 %v1202_v20, %v1073_v48 }
 0x9bb   : > { %v1598_v33 = vpop.eup %1597  ;;  %v1233_v34 = vmul.f32 %v1201_v21, %v1072_v58 }
 0x9bc   : > { %1243 = vrot.lane.b32.xlu1 %v1234_v32, %s1776_s18  ;;  %v1203_v35 = vmul.f32 %v1598_v33, %v2097_v46 }
 0x9bd   : > { %1241 = vrot.lane.b32.xlu0 %v1233_v34, %s1776_s18 }
 0x9be   : > { %v1235_v38 = vmul.f32 %v1203_v35, %v1074_v49 }
 0x9bf   : > { %v1600_v39 = vpop.eup %1599 }
 0x9c0   : > { %1245 = vrot.lane.b32.xlu1 %v1235_v38, %s1776_s18  ;;  %v1204_v25 = vmul.f32 %v1600_v39, %v2102_v51 }
 0x9c1   : > { %1207 = vperm.xlu0 %1573, %v1201_v21  }
 0x9c2   : > { %v1236_v26 = vmul.f32 %v1204_v25, %v1075_v6  ;;  %v1604_v6 = vld [vmem:[#allocation2 + $0x8] sm:$0xff] }
 0x9c4   : > { %1247 = vrot.lane.b32.xlu1 %v1236_v26, %s1776_s18 }
 0x9c5   : > { %1222 = vperm.xlu0 %1573, %v1204_v25  }
 0x9c8   : > { %1212 = vperm.xlu1 %1574, %v1202_v20  }
 0x9c9   : > { %1576 = vset.pattern.permute.xlu0 %v1781_v40 }
 0x9cc   : > { %1217 = vperm.xlu1 %1574, %v1203_v35  }
 0x9d0   : > { %1575 = vset.pattern.permute.xlu1 %v1781_v40 }
 0xa2e   : > { %v1244_v43 = vpop.permute.xlu1 %1243 }
 0xa2f   : > { %v1254_v44 = vsub.f32 %v2092_v41, %v1244_v43  ;;  %v1242_v28 = vpop.permute.xlu0 %1241 }
 0xa30   : > { %v1253_v37 = vsub.f32 %v2088_v36, %v1242_v28 }
 0xa31   : > { %1264 = vperm.xlu0 %1576, %v1254_v44  }
 0xa32   : > { %1259 = vperm.xlu1 %1575, %v1253_v37   ;;  %v1246_v29 = vpop.permute.xlu1 %1245 }
 0xa33   : > { %v1255_v42 = vsub.f32 %v2097_v46, %v1246_v29 }
 0xa36   : > { %1269 = vperm.xlu1 %1575, %v1255_v42   ;;  %v1248_v45 = vpop.permute.xlu1 %1247 }
 0xa37   : > { %v1256_v47 = vsub.f32 %v2102_v51, %v1248_v45  ;;  %v1601_v51 = vld [vmem:[#allocation2 + $0x10] sm:$0xff] }
 0xa3a   : > { %1274 = vperm.xlu1 %1575, %v1256_v47  }
 0xa40   : > { %v1208_v52 = vpop.permute.xlu0 %1207 }
 0xa41   : > { %v1225_v36 = vmul.f32 %v1208_v52, %v2210_v12  ;;  %v1226_v49 = vmul.f32 %v1208_v52, %v2212_v13 }
 0xa44   : > { %v1223_v57 = vpop.permute.xlu0 %1222 }
 0xa45   : > { %v1231_v1 = vmul.f32 %v1223_v57, %v2234_v30  ;;  %v1232_v10 = vmul.f32 %v1223_v57, %v2238_v31  ;;  %v1607_v30 = vld [vmem:[#allocation2 + $0x30] sm:$0xff] }
 0xa47   : > { %v1213_v55 = vpop.permute.xlu1 %1212 }
 0xa48   : > { %v1227_v48 = vmul.f32 %v1213_v55, %v2217_v15  ;;  %v1228_v41 = vmul.f32 %v1213_v55, %v2221_v19 }
 0xa4b   : > { %v1218_v58 = vpop.permute.xlu1 %1217 }
 0xa4c   : > { %v1229_v4 = vmul.f32 %v1218_v58, %v2228_v23  ;;  %v1230_v15 = vmul.f32 %v1218_v58, %v2230_v24  ;;  %v1605_v23 = vld [vmem:[#allocation2 + $0x20] sm:$0xff] }
 0xab0   : > { %v1265_v61 = vpop.permute.xlu0 %1264 }
 0xab1   : > { %v1260_v50 = vpop.permute.xlu1 %1259  ;;  %v1279_v46 = vadd.f32 %v1265_v61, %v1227_v48  ;;  %v1280_v54 = vadd.f32 %v1265_v61, %v1228_v41 }
 0xab2   : > { %v1277_v56 = vadd.f32 %v1260_v50, %v1225_v36  ;;  %v1278_v63 = vadd.f32 %v1260_v50, %v1226_v49 }
 0xab3   : > { %v1287_v53 = vadd.f32 %v1601_v51, %v1279_v46  ;;  %v1288_v3 = vadd.f32 %v1602_v2, %v1280_v54 }
 0xab4   : > { %v1285_v19 = vadd.f32 %v1603_v5, %v1277_v56  ;;  %v1286_v12 = vadd.f32 %v1604_v6, %v1278_v63 }
 0xab5   : > { %v1295_v59 = vmax.f32 %v1287_v53, 0.0  ;;  %v1296_v13 = vmax.f32 %v1288_v3, 0.0  ;;  %v1270_v60 = vpop.permute.xlu1 %1269 }
 0xab6   : > { %v1293_v7 = vmax.f32 %v1285_v19, 0.0  ;;  %v1294_v8 = vmax.f32 %v1286_v12, 0.0  ;;  %v1281_v9 = vadd.f32 %v1270_v60, %v1229_v4  ;;  %v1282_v62 = vadd.f32 %v1270_v60, %v1230_v15 }
 0xab7   : > { %1303 = vst [vmem:[#allocation2 + $0x10] sm:$0xff] %v1295_v59  ;;  %1304 = vst [vmem:[#allocation2 + $0x18] sm:$0xff] %v1296_v13 }
 0xab8   : > { %1301 = vst [vmem:[#allocation2] sm:$0xff] %v1293_v7  ;;  %1302 = vst [vmem:[#allocation2 + $0x8] sm:$0xff] %v1294_v8  ;;  %v1289_v24 = vadd.f32 %v1605_v23, %v1281_v9  ;;  %v1290_v14 = vadd.f32 %v1606_v11, %v1282_v62 }
 0xab9   : > { %v1275_v16 = vpop.permute.xlu1 %1274 }
 0xaba   : > { %v1297_v0 = vmax.f32 %v1289_v24, 0.0  ;;  %v1298_v22 = vmax.f32 %v1290_v14, 0.0  ;;  %v1283_v27 = vadd.f32 %v1275_v16, %v1231_v1  ;;  %v1284_v17 = vadd.f32 %v1275_v16, %v1232_v10 }
 0xabc   : > { %1305 = vst [vmem:[#allocation2 + $0x20] sm:$0xff] %v1297_v0  ;;  %1306 = vst [vmem:[#allocation2 + $0x28] sm:$0xff] %v1298_v22  ;;  %v1291_v31 = vadd.f32 %v1607_v30, %v1283_v27  ;;  %v1292_v20 = vadd.f32 %v1608_v18, %v1284_v17 }
 0xabe   : > { %v1299_v21 = vmax.f32 %v1291_v31, 0.0  ;;  %v1300_v32 = vmax.f32 %v1292_v20, 0.0 }
 0xac0   : > { %1307 = vst [vmem:[#allocation2 + $0x30] sm:$0xff] %v1299_v21  ;;  %1308 = vst [vmem:[#allocation2 + $0x38] sm:$0xff] %v1300_v32 }
 0xac1   : > { %1708 = shalt.err (!%p1705_p5)  }
 0xac2   : > { %s1709_s24 = scalar_lea.hbm %s2325_s5, 1024 }
 0xac3   : > { %p1710_p12 = scmp.ne.s32.totalorder %s2325_s5, %s1709_s24  ;;  %p1715_p1 = scmp.lt.u32.totalorder %s1709_s24, %s2325_s5 }
 0xac5   : > { %p1711_p3 = pnand %p1710_p12, %p1521_p11 }
 0xac7   : > { %p1712_p4 = pneg %p1711_p3 }
 0xac9   : > { %p1717_p6 = pnand %p1715_p1, %p1712_p4 }
 0xacb   : > { %1720 = shalt.err (!%p1717_p6)  }
 0xacc   : > { %1510 = dma.vmem_to_hbm [thread:$0]  (%p1521_p11), %s1961_s13, 1024, %s2325_s5, [#allocation3] }
 0xacd   : > { %1750 = dma.done.wait (%p1521_p11), [#allocation3], 1024 }
 0xace   : > { %1752 = vsyncadd (%p1521_p11), [#allocation3], 4294966272 }
 0xacf PF: > { %p18_p10 = scmp.ge.s32.totalorder %s1834_s23, 5   ;;  %s2334_s18 = smov %s1759_s19 }
 0xad0   : > { %s2335_s19 = smov %s1763_s20  ;;  %s2336_s20 = smov %s1844_s26 }
 0xad1   : > { %s2337_s21 = smov %s1834_s23  ;;  %20 = sbr.rel (!%p18_p10) target bundleno = 5 (0x5), region = 95 }
 0xad8   :  { %1328 = vsyncpa [#allocation5], 1 }
 0xad9   :  { %1330 = vsyncpa [#allocation5 + $0x1], 1 }
 0xada   :  { %1331 = vsyncpa [#allocation7], 1 }
 0xadb   :  { %1333 = vsyncpa [#allocation7 + $0x1], 1 }
 0xadc   :  { %1334 = vsyncmov [#allocation3] }
 0xadf   :  { %s1335_s22 = vpop.sfrf %1334 }
 0xae0   :  { %p1445_p8 = scmp.ne.s32.totalorder %s1335_s22, 0 }
 0xae2   :  { %1339 = shalt.err (%p1445_p8)  }

</bundles_post_ra>
